<compile_context>
chip_gen: v7x
topology: tpu7x:2x2x1
jax: 0.10.0
libtpu: 0.0.40
codegen_flags: <defaults>
</compile_context>

<pallas_src>
import math
from typing import List, NamedTuple, Tuple

import jax
import jax.numpy as jnp
import numpy as np
from jax.experimental import pallas as pl
from jax.experimental.pallas import tpu as pltpu


class ImageList(NamedTuple):
    tensors: jnp.ndarray                    # (N, C, H_pad, W_pad) uint8
    image_sizes: List[Tuple[int, int]]      # resized (H_out, W_out) per image


def _scale_factor(h, w, min_size, max_size):
    mn, mx = float(min(h, w)), float(max(h, w))
    sf = float(min_size) / mn
    if mx * sf > float(max_size):
        sf = float(max_size) / mx
    return sf


def _nearest_src_idx(out_size, in_size, sf):
    # PyTorch upsample_nearest with explicit scale: src = min(floor(dst / sf), in-1)
    return np.minimum(np.floor(np.arange(out_size) * (1.0 / sf)),
                      in_size - 1).astype(np.int32)


def _pick_tiling(nc, h_in, w_in, h_pad, w_pad, vmem_budget_bytes=16 * 1024 * 1024):
    """Pick slabs-per-grid-step (TB) and number of grid steps (G)."""
    per_slab = (
        2 * h_in * w_in            # uint8 input block, double-buffered
        + 2 * h_pad * w_pad        # uint8 output block, double-buffered
        + 2 * h_in * w_in          # bf16 cast of the input slab
        + 4 * h_in * w_pad         # f32 stage-1 temp
        + 2 * h_in * w_pad         # bf16 copy of the stage-1 temp
    )
    tb = int(max(1, min(nc, vmem_budget_bytes // per_slab)))
    # Keep at least 2 parallel grid steps when possible so both v7x TensorCores
    # get work (neutral on v5e/v6e, which have a single TensorCore).
    if tb >= nc and nc >= 2:
        tb = (nc + 1) // 2
    g = -(-nc // tb)               # cdiv
    return tb, g


def _make_resize_pad_kernel(tb, h_in):
    def kernel(x_ref, r_ref, ct_ref, o_ref):
        # x_ref : (1, tb*h_in, W_in)   uint8   tb (image,channel) slabs, rows stacked
        # r_ref : (H_pad, H_in)        bf16    one-hot row selector (zero rows => pad)
        # ct_ref: (W_in, W_pad)        bf16    one-hot col selector (zero cols => pad)
        # o_ref : (tb, H_pad, W_pad)   uint8
        #
        # uint8 -> i32 -> f32 -> bf16: explicit widening chain (cheap VPU ops);
        # HBM traffic stays uint8, casts are fused into the kernel.
        x = x_ref[0].astype(jnp.int32).astype(jnp.float32).astype(jnp.bfloat16)

        # Stage 1: nearest-neighbour column selection + right zero-pad as ONE tall
        # matmul so the MXU sees M = tb*h_in rather than M = h_in.
        tmp = jnp.dot(x, ct_ref[...], preferred_element_type=jnp.float32)
        tmp = tmp.astype(jnp.bfloat16)            # (tb*h_in, W_pad), exact ints 0..255

        r = r_ref[...]
        # Stage 2: row selection + bottom zero-pad, one matmul per slab (tb is
        # small, static unroll).  Everything stays exact integers 0..255.
        for b in range(tb):
            o = jnp.dot(r, tmp[b * h_in:(b + 1) * h_in, :],
                        preferred_element_type=jnp.float32)   # (H_pad, W_pad)
            # f32 -> i32 -> u8 (exact: values are exact integers in [0, 255])
            o_ref[b] = o.astype(jnp.int32).astype(jnp.uint8)

    return kernel


def resize_and_batch(images_u8, min_size, max_size, size_divisible=32):
    """images_u8: (N, C, H, W) uint8 — all images in this batch share a shape."""
    # TODO(synk): ragged per-image (H, W) lists (as the PyTorch module supports)
    # would need per-image selector matrices + PrefetchScalarGridSpec; this
    # wrapper assumes a stacked tensor with one shared shape per call.
    N, C, H_in, W_in = images_u8.shape
    sf = _scale_factor(H_in, W_in, min_size, max_size)
    H_out = int(math.floor(H_in * sf))
    W_out = int(math.floor(W_in * sf))
    H_pad = -(-H_out // size_divisible) * size_divisible
    W_pad = -(-W_out // size_divisible) * size_divisible

    src_h = _nearest_src_idx(H_out, H_in, sf)
    src_w = _nearest_src_idx(W_out, W_in, sf)

    # One-hot selection matrices; zero rows/cols past (H_out, W_out) realize the
    # zero padding.  bf16 is exact for 0/1 and for pixel values 0..255.
    R = np.zeros((H_pad, H_in), np.float32)
    R[np.arange(H_out), src_h] = 1.0
    Ct = np.zeros((W_in, W_pad), np.float32)
    Ct[src_w, np.arange(W_out)] = 1.0
    r_bf = jnp.asarray(R, dtype=jnp.bfloat16)
    ct_bf = jnp.asarray(Ct, dtype=jnp.bfloat16)

    nc = N * C
    tb, g = _pick_tiling(nc, H_in, W_in, H_pad, W_pad)
    nc_pad = tb * g

    x = images_u8.reshape(nc, H_in, W_in)
    if nc_pad != nc:
        x = jnp.concatenate(
            [x, jnp.zeros((nc_pad - nc, H_in, W_in), jnp.uint8)], axis=0)
    # Cheap uint8 reshape: tb slabs stacked along rows per grid step.
    x = x.reshape(g, tb * H_in, W_in)

    out = pl.pallas_call(
        _make_resize_pad_kernel(tb, H_in),
        out_shape=jax.ShapeDtypeStruct((nc_pad, H_pad, W_pad), jnp.uint8),
        grid=(g,),
        in_specs=[
            pl.BlockSpec((1, tb * H_in, W_in), lambda i: (i, 0, 0)),
            # R / Ct are grid-constant; default double-buffering wastes a little
            # VMEM on large images (pl.Buffered(1) would reclaim it) but keeps
            # the lowering simple and robust.
            pl.BlockSpec((H_pad, H_in), lambda i: (0, 0)),
            pl.BlockSpec((W_in, W_pad), lambda i: (0, 0)),
        ],
        out_specs=pl.BlockSpec((tb, H_pad, W_pad), lambda i: (i, 0, 0)),
        compiler_params=pltpu.CompilerParams(
            dimension_semantics=("parallel",),
            vmem_limit_bytes=48 * 1024 * 1024,   # stays under v7x's 64 MiB VMEM
        ),
    )(x, r_bf, ct_bf)

    if nc_pad != nc:
        out = out[:nc]
    batched = out.reshape(N, C, H_pad, W_pad)     # uint8 end to end
    return ImageList(batched, [(H_out, W_out)] * N)


class MaskTransformVRB:
    """JAX/Pallas port.  min_size/max_size as in the PyTorch module (no params)."""

    def __init__(self, min_size, max_size):
        if not isinstance(min_size, (list, tuple)):
            min_size = (min_size,)
        self.min_size = min_size
        self.max_size = max_size

    def process_inputs(self, images):
        # images: (N, C, H, W) uint8 stack (images within one list share a shape).
        return resize_and_batch(images, float(self.min_size[-1]), float(self.max_size))

    def forward(self, person_inputs, obj_inputs, targets=None):
        person_image_list = self.process_inputs(person_inputs)
        obj_image_list = self.process_inputs(obj_inputs)
        return (person_image_list, obj_image_list, targets)

    __call__ = forward


# ------------------------ numpy reference for verification ------------------------
def _ref_resize_batch(images_u8, min_size, max_size, size_divisible=32):
    imgs = np.asarray(images_u8)
    N, C, H_in, W_in = imgs.shape
    sf = _scale_factor(H_in, W_in, min_size, max_size)
    H_out = int(math.floor(H_in * sf))
    W_out = int(math.floor(W_in * sf))
    H_pad = int(math.ceil(H_out / float(size_divisible)) * size_divisible)
    W_pad = int(math.ceil(W_out / float(size_divisible)) * size_divisible)
    src_h = _nearest_src_idx(H_out, H_in, sf)
    src_w = _nearest_src_idx(W_out, W_in, sf)
    resized = imgs[:, :, src_h][:, :, :, src_w]          # nearest gather, uint8-exact
    out = np.zeros((N, C, H_pad, W_pad), np.uint8)
    out[:, :, :H_out, :W_out] = resized
    return out, (H_out, W_out)


if __name__ == "__main__":
    key = jax.random.PRNGKey(0)
    k1, k2 = jax.random.split(key)

    # person masks: 2 images x 4 masks x 16 x 16 ; object masks: 2 images x 3 masks x 20 x 12
    person_inputs = jax.random.randint(k1, (2, 4, 16, 16), 0, 256, dtype=jnp.int32).astype(jnp.uint8)
    obj_inputs = jax.random.randint(k2, (2, 3, 20, 12), 0, 256, dtype=jnp.int32).astype(jnp.uint8)

    model = MaskTransformVRB(min_size=24, max_size=48)
    person_il, obj_il, targets = model(person_inputs, obj_inputs, targets=None)
    jax.block_until_ready(person_il.tensors)
    jax.block_until_ready(obj_il.tensors)

    # verify against pure-numpy nearest-resize + pad reference
    ref_p, size_p = _ref_resize_batch(person_inputs, 24.0, 48.0)
    ref_o, size_o = _ref_resize_batch(obj_inputs, 24.0, 48.0)
    assert np.array_equal(np.asarray(person_il.tensors), ref_p)
    assert np.array_equal(np.asarray(obj_il.tensors), ref_o)
    assert person_il.image_sizes == [size_p] * 2
    assert obj_il.image_sizes == [size_o] * 2
    assert targets is None

    print("KERNEL_OK")
</pallas_src>

<mosaic_0001>
module attributes {stable_mosaic.version = 11 : i64} {
  func.func @kernel(%arg0: i32, %arg1: memref<1x64x16xi8, #tpu.memory_space<vmem>>, %arg2: memref<32x16xbf16, #tpu.memory_space<vmem>>, %arg3: memref<16x32xbf16, #tpu.memory_space<vmem>>, %arg4: memref<4x32x32xi8, #tpu.memory_space<vmem>>) attributes {dimension_semantics = [#tpu.dimension_semantics<parallel>], iteration_bounds = array<i64: 2>, scalar_prefetch = 0 : i64, scratch_operands = 0 : i64, tpu.core_type = #tpu.core_type<tc>, window_params = [{transform_indices = @transform_0, window_bounds = array<i64: 1, 64, 16>}, {pipeline_mode = #tpu.pipeline_mode<synchronous>, transform_indices = @transform_1, window_bounds = array<i64: 32, 16>}, {pipeline_mode = #tpu.pipeline_mode<synchronous>, transform_indices = @transform_2, window_bounds = array<i64: 16, 32>}, {transform_indices = @transform_3, window_bounds = array<i64: 4, 32, 32>}]} {
    %c0 = arith.constant 0 : index
    %c0_0 = arith.constant 0 : index
    %c0_1 = arith.constant 0 : index
    %0 = vector.load %arg1[%c0, %c0_0, %c0_1] : memref<1x64x16xi8, #tpu.memory_space<vmem>>, vector<1x64x16xi8>
    %1 = vector.shape_cast %0 : vector<1x64x16xi8> to vector<64x16xi8>
    %2 = arith.extui %1 : vector<64x16xi8> to vector<64x16xi32>
    %3 = arith.sitofp %2 : vector<64x16xi32> to vector<64x16xf32>
    %4 = arith.truncf %3 : vector<64x16xf32> to vector<64x16xbf16>
    %c0_2 = arith.constant 0 : index
    %c0_3 = arith.constant 0 : index
    %5 = vector.load %arg3[%c0_2, %c0_3] : memref<16x32xbf16, #tpu.memory_space<vmem>>, vector<16x32xbf16>
    %cst = arith.constant dense<0.000000e+00> : vector<64x32xf32>
    %6 = tpu.matmul %4, %5, %cst {dimension_numbers = #tpu.dot_dimension_numbers<[1], [0], [0], [1], [0, 0, 1, 1], [], []>} : vector<64x16xbf16>, vector<16x32xbf16>, vector<64x32xf32> -> vector<64x32xf32>
    %7 = arith.truncf %6 : vector<64x32xf32> to vector<64x32xbf16>
    %c0_4 = arith.constant 0 : index
    %c0_5 = arith.constant 0 : index
    %8 = vector.load %arg2[%c0_4, %c0_5] : memref<32x16xbf16, #tpu.memory_space<vmem>>, vector<32x16xbf16>
    %9 = vector.extract_strided_slice %7 {offsets = [0, 0], sizes = [16, 32], strides = [1, 1]} : vector<64x32xbf16> to vector<16x32xbf16>
    %cst_6 = arith.constant dense<0.000000e+00> : vector<32x32xf32>
    %10 = tpu.matmul %8, %9, %cst_6 {dimension_numbers = #tpu.dot_dimension_numbers<[1], [0], [0], [1], [0, 0, 1, 1], [], []>} : vector<32x16xbf16>, vector<16x32xbf16>, vector<32x32xf32> -> vector<32x32xf32>
    %11 = arith.fptosi %10 : vector<32x32xf32> to vector<32x32xi32>
    %12 = arith.trunci %11 : vector<32x32xi32> to vector<32x32xi8>
    %c0_7 = arith.constant 0 : index
    %c0_8 = arith.constant 0 : index
    %c0_9 = arith.constant 0 : index
    %13 = vector.load %arg4[%c0_7, %c0_8, %c0_9] : memref<4x32x32xi8, #tpu.memory_space<vmem>>, vector<1x32x32xi8>
    %14 = vector.shape_cast %13 : vector<1x32x32xi8> to vector<32x32xi8>
    %15 = vector.shape_cast %12 : vector<32x32xi8> to vector<1x32x32xi8>
    tpu.vector_store %arg4[%c0_7, %c0_8, %c0_9], %15 {strides = array<i32>} : memref<4x32x32xi8, #tpu.memory_space<vmem>>, vector<1x32x32xi8>,
    %16 = vector.extract_strided_slice %7 {offsets = [16, 0], sizes = [16, 32], strides = [1, 1]} : vector<64x32xbf16> to vector<16x32xbf16>
    %cst_10 = arith.constant dense<0.000000e+00> : vector<32x32xf32>
    %17 = tpu.matmul %8, %16, %cst_10 {dimension_numbers = #tpu.dot_dimension_numbers<[1], [0], [0], [1], [0, 0, 1, 1], [], []>} : vector<32x16xbf16>, vector<16x32xbf16>, vector<32x32xf32> -> vector<32x32xf32>
    %18 = arith.fptosi %17 : vector<32x32xf32> to vector<32x32xi32>
    %19 = arith.trunci %18 : vector<32x32xi32> to vector<32x32xi8>
    %c1 = arith.constant 1 : index
    %c0_11 = arith.constant 0 : index
    %c0_12 = arith.constant 0 : index
    %20 = vector.load %arg4[%c1, %c0_11, %c0_12] : memref<4x32x32xi8, #tpu.memory_space<vmem>>, vector<1x32x32xi8>
    %21 = vector.shape_cast %20 : vector<1x32x32xi8> to vector<32x32xi8>
    %22 = vector.shape_cast %19 : vector<32x32xi8> to vector<1x32x32xi8>
    tpu.vector_store %arg4[%c1, %c0_11, %c0_12], %22 {strides = array<i32>} : memref<4x32x32xi8, #tpu.memory_space<vmem>>, vector<1x32x32xi8>,
    %23 = vector.extract_strided_slice %7 {offsets = [32, 0], sizes = [16, 32], strides = [1, 1]} : vector<64x32xbf16> to vector<16x32xbf16>
    %cst_13 = arith.constant dense<0.000000e+00> : vector<32x32xf32>
    %24 = tpu.matmul %8, %23, %cst_13 {dimension_numbers = #tpu.dot_dimension_numbers<[1], [0], [0], [1], [0, 0, 1, 1], [], []>} : vector<32x16xbf16>, vector<16x32xbf16>, vector<32x32xf32> -> vector<32x32xf32>
    %25 = arith.fptosi %24 : vector<32x32xf32> to vector<32x32xi32>
    %26 = arith.trunci %25 : vector<32x32xi32> to vector<32x32xi8>
    %c2 = arith.constant 2 : index
    %c0_14 = arith.constant 0 : index
    %c0_15 = arith.constant 0 : index
    %27 = vector.load %arg4[%c2, %c0_14, %c0_15] : memref<4x32x32xi8, #tpu.memory_space<vmem>>, vector<1x32x32xi8>
    %28 = vector.shape_cast %27 : vector<1x32x32xi8> to vector<32x32xi8>
    %29 = vector.shape_cast %26 : vector<32x32xi8> to vector<1x32x32xi8>
    tpu.vector_store %arg4[%c2, %c0_14, %c0_15], %29 {strides = array<i32>} : memref<4x32x32xi8, #tpu.memory_space<vmem>>, vector<1x32x32xi8>,
    %30 = vector.extract_strided_slice %7 {offsets = [48, 0], sizes = [16, 32], strides = [1, 1]} : vector<64x32xbf16> to vector<16x32xbf16>
    %cst_16 = arith.constant dense<0.000000e+00> : vector<32x32xf32>
    %31 = tpu.matmul %8, %30, %cst_16 {dimension_numbers = #tpu.dot_dimension_numbers<[1], [0], [0], [1], [0, 0, 1, 1], [], []>} : vector<32x16xbf16>, vector<16x32xbf16>, vector<32x32xf32> -> vector<32x32xf32>
    %32 = arith.fptosi %31 : vector<32x32xf32> to vector<32x32xi32>
    %33 = arith.trunci %32 : vector<32x32xi32> to vector<32x32xi8>
    %c3 = arith.constant 3 : index
    %c0_17 = arith.constant 0 : index
    %c0_18 = arith.constant 0 : index
    %34 = vector.load %arg4[%c3, %c0_17, %c0_18] : memref<4x32x32xi8, #tpu.memory_space<vmem>>, vector<1x32x32xi8>
    %35 = vector.shape_cast %34 : vector<1x32x32xi8> to vector<32x32xi8>
    %36 = vector.shape_cast %33 : vector<32x32xi8> to vector<1x32x32xi8>
    tpu.vector_store %arg4[%c3, %c0_17, %c0_18], %36 {strides = array<i32>} : memref<4x32x32xi8, #tpu.memory_space<vmem>>, vector<1x32x32xi8>,
    return
  }
  func.func @transform_0(%arg0: i32) -> (i32, i32, i32) {
    %c0_i32 = arith.constant 0 : i32
    %c0_i32_0 = arith.constant 0 : i32
    %c0_i32_1 = arith.constant 0 : i32
    return %arg0, %c0_i32, %c0_i32_0 : i32, i32, i32
  }
  func.func @transform_1(%arg0: i32) -> (i32, i32) {
    %c0_i32 = arith.constant 0 : i32
    %c0_i32_0 = arith.constant 0 : i32
    %c0_i32_1 = arith.constant 0 : i32
    return %c0_i32, %c0_i32_0 : i32, i32
  }
  func.func @transform_2(%arg0: i32) -> (i32, i32) {
    %c0_i32 = arith.constant 0 : i32
    %c0_i32_0 = arith.constant 0 : i32
    %c0_i32_1 = arith.constant 0 : i32
    return %c0_i32, %c0_i32_0 : i32, i32
  }
  func.func @transform_3(%arg0: i32) -> (i32, i32, i32) {
    %c0_i32 = arith.constant 0 : i32
    %c0_i32_0 = arith.constant 0 : i32
    %c0_i32_1 = arith.constant 0 : i32
    return %arg0, %c0_i32, %c0_i32_0 : i32, i32, i32
  }
}

</mosaic_0001>

<bundles_post_ra>
// kernel: tpu_custom_call.1
= control target key start
LH: loop header
LB: loop body
LE: loop exit
PB: predicated region body
PF: predicated region fallthrough
CT: control target
= control target key end

     0   :  { %8 = vsyncpa [#allocation3], 0  ;;  %s980_s0 = inlined_call_operand.vmem [shape: u8[2,64,16], index: 0, kind: input, shape index: {}]   ;;  %s981_s1 = inlined_call_operand.vmem [shape: bf16[32,16], index: 1, kind: input, shape index: {}]   ;;  %s982_s2 = inlined_call_operand.vmem [shape: bf16[16,32], index: 2, kind: input, shape index: {}]   ;;  %s983_s3 = inlined_call_operand.hbm [shape: u8[8,32,32], index: 3, kind: output, shape index: {}]  }
   0x1   :  { %10 = vsyncpa [#allocation3 + $0x1], 0  ;;  %s841_s12 = smov 0   ;;  %s843_s13 = smov 0  }
   0x2   :  { %s845_s14 = smov 0   ;;  %s847_s15 = smov 0  }
   0x3 LB: > { %s862_s16 = sadd.s32 4294967295, %s816_s15   ;;  %s595_s17 = sadd.s32 4294967294, %s816_s15   ;;  %s816_s15 = sphi %s847_s15, %s989_s15   ;;  %s812_s14 = sphi %s845_s14, %s988_s14   ;;  %s808_s13 = sphi %s843_s13, %s987_s13   ;;  %s804_s12 = sphi %s841_s12, %s986_s12  }
   0x4   : > { %s866_s18 = sadd.s32 1, %s816_s15   ;;  %s91_s19 = sadd.s32 1, %s812_s14 }
   0x5   : > { %s88_s20 = ssub.s32 %s816_s15, %s866_s18  ;;  %p101_p0 = scmp.ne.s32.totalorder %s812_s14, %s808_s13 }
   0x6   : > { %p89_p1 = scmp.eq.s32.totalorder %s88_s20, 0  ;;  %p102_p2 = scmp.eq.s32.totalorder %s862_s16, 1 }
   0x7   : > { %p107_p3 = scmp.ne.s32.totalorder %s808_s13, %s804_s12  ;;  %p108_p4 = scmp.eq.s32.totalorder %s595_s17, 1 }
   0x8   : > { %s877_s21 = scalar_select %p89_p1, %s812_s14, %s91_s19  }
   0x9   : > { %p879_p5 = por %p102_p2, %p101_p0  ;;  %p883_p6 = por %p108_p4, %p107_p3 }
   0xa   : > { %p598_p7 = scmp.ge.s32.totalorder %s816_s15, 1  ;;  %p140_p8 = scmp.lt.s32.totalorder %s816_s15, 3 }
   0xc   : > { %p141_p9 = pnand %p598_p7, %p140_p8 }
   0xd   : > { %v751_v0 = vld [vmem:[%s982_s2] sm:$0xff] (!%p141_p9)   ;;  %p164_p10 = scmp.lt.s32.totalorder (!%p141_p9), %s862_s16, 1  ;;  %vm185_vm0 = vcmask (!%p141_p9), 130048   ;;  %v753_v14 = vld [vmem:[%s981_s1 + $0x8] sm:$0xff] (!%p141_p9)   ;;  %s161_s8 = sand.u32 (!%p141_p9), 1, %s808_s13   ;;  %vm343_vm1 = vcmask (!%p141_p9), 261120  }
   0xe   : > { %144 = sbr.rel (%p141_p9) target bundleno = 504 (0x1f8), region = 32  ;;  %644 = vmatprep.subr.bf16.mxu0 (!%p141_p9), %v751_v0  ;;  %v752_v7 = vld [vmem:[%s981_s1] sm:$0xff] (!%p141_p9)   ;;  %s599_s9 = sshll.u32 (!%p141_p9), %s161_s8, 5 }
   0xf   : > { %645 = vmatpush3.bf16.msra.mxu0 (!%p141_p9), %v751_v0  ;;  %656 = vmatprep.mubr.msk.bf16.mxu1 (!%p141_p9), %vm185_vm0, %v752_v7  ;;  %s918_s10 = scalar_lea.vmem (!%p141_p9), [#allocation2], %s599_s9  ;;  %s626_s11 = sshll.u32 (!%p141_p9), %s862_s16, 9 }
  0x10   : > { %s533_s17 = sshll.u32 (!%p141_p9), %s918_s10, 4  ;;  %s931_s24 = scalar_lea.hbm (!%p141_p9), %s983_s3, %s626_s11  ;;  %s933_s17 = int_to_ptr.vmem [resolvable:$true] %s533_s17 }
  0x11   : > { %s939_s25 = scalar_lea.sflag (!%p141_p9), [#allocation3], %s161_s8 }
  0x15   : > { %s165_s26 = scalar_select %p164_p10, %s862_s16, 1 }
  0x16   : > { %s754_s16 = scalar_lea.vmem %s933_s17, 512 }
  0x17   : > { %s625_s27 = sshll.u32 %s165_s26, 4  ;;  %p755_p11 = scmp.ne.s32.totalorder %s933_s17, %s754_s16 }
  0x18   : > { %s168_s30 = scalar_lea.vmem %s980_s0, %s625_s27  ;;  %s818_s26 = smov [#allocation2]  }
  0x19   : > { %v171_v1 = vld [vmem:[%s168_s30] sm:$0xff]  ;;  %v172_v2 = vld [vmem:[%s168_s30 + $0x8] sm:$0xff]  ;;  %p756_p12 = pnand %p755_p11, %p879_p5  ;;  %s758_s27 = sshll.u32 %s818_s26, 4  ;;  %s759_s27 = int_to_ptr.vmem [resolvable:$false] %s758_s27 }
  0x1a   : > { %v173_v3 = vunpack.c.l.u8.bf16 %v171_v1  ;;  %v174_v4 = vunpack.c.h.u8.bf16 %v171_v1  ;;  %v175_v5 = vunpack.c.l.u8.bf16 %v172_v2  ;;  %v176_v6 = vunpack.c.h.u8.bf16 %v172_v2  ;;  %s760_s28 = scalar_lea.vmem %s759_s27, 1024  ;;  %p761_p0 = scmp.lt.s32.totalorder %s933_s17, %s759_s27 }
  0x1b   : > { %p757_p13 = pneg %p756_p12  ;;  %p762_p1 = scmp.lt.s32.totalorder %s760_s28, %s754_s16 }
  0x1c   : > { %646 = vmatprep.mubr.msk.bf16.mxu0 %vm185_vm0, %v173_v3 }
  0x1d   : > { %647 = vmatmul.mubr.msk.bf16.vlgmr.msra.gmra.mrb[0].mxu0 %vm185_vm0, %v174_v4  ;;  %p763_p2 = por %p762_p1, %p761_p0 }
  0x1e   : > { %650 = vmatprep.mubr.msk.bf16.mxu0 %vm185_vm0, %v175_v5 }
  0x1f   : > { %p764_p3 = pnand %p763_p2, %p757_p13 }
  0x25   : > { %651 = vmatmul.mubr.msk.bf16.gmra.mrb[4].mxu0 %vm185_vm0, %v176_v6 }
  0x26   : > { %668 = vmatprep.mubr.msk.bf16.mxu0 %vm185_vm0, %v752_v7 }
  0xf0   : > { %v648_v8 = vpop.f32.mrb[0].mxu0 }
  0xf1   : > { %v232_v9 = vpop.f32.mrb[1].mxu0 }
  0xf2   : > { %v649_v10 = vpop.f32.mrb[2].mxu0 }
  0xf3   : > { %v264_v11 = vpack.c.bf16 %v649_v10, %v648_v8  ;;  %v235_v12 = vpop.f32.mrb[3].mxu0 }
  0xf4   : > { %v263_v13 = vpack.c.bf16 %v235_v12, %v232_v9 }
  0xf6   : > { %654 = vmatprep.subr.bf16.mxu1 %v263_v13 }
  0xf7   : > { %655 = vmatpush3.bf16.msra.mxu1 %v263_v13 }
  0xf8   : > { %v652_v15 = vpop.f32.mrb[4].mxu0  ;;  %660 = vmatprep.subr.bf16.mxu1 %v264_v11 }
  0xf9   : > { %v248_v16 = vpop.f32.mrb[5].mxu0 }
  0xfa   : > { %v653_v17 = vpop.f32.mrb[6].mxu0  ;;  %657 = vmatmul.mubr.msk.bf16.vlgmr.msra.gmra.mrb[0].mxu1 %vm185_vm0, %v753_v14 }
  0xfb   : > { %v266_v18 = vpack.c.bf16 %v653_v17, %v652_v15  ;;  %v251_v19 = vpop.f32.mrb[7].mxu0  ;;  %661 = vmatpush3.bf16.msra.mxu1 %v264_v11  ;;  %662 = vmatprep.mubr.msk.bf16.mxu1 %vm185_vm0, %v752_v7 }
  0xfc   : > { %v265_v20 = vpack.c.bf16 %v251_v19, %v248_v16 }
  0xfd   : > { %672 = vmatprep.subr.bf16.mxu1 %v266_v18 }
  0xfe   : > { %666 = vmatprep.subr.bf16.mxu0 %v265_v20 }
  0xff   : > { %667 = vmatpush3.bf16.msra.mxu0 %v265_v20 }
 0x102   : > { %663 = vmatmul.mubr.msk.bf16.vlgmr.msra.gmra.mrb[4].mxu1 %vm185_vm0, %v753_v14  ;;  %669 = vmatmul.mubr.msk.bf16.vlgmr.msra.gmra.mrb[8].mxu0 %vm185_vm0, %v753_v14 }
 0x103   : > { %673 = vmatpush3.bf16.msra.mxu1 %v266_v18  ;;  %674 = vmatprep.mubr.msk.bf16.mxu1 %vm185_vm0, %v752_v7 }
 0x10a   : > { %675 = vmatmul.mubr.msk.bf16.vlgmr.msra.gmra.mrb[8].mxu1 %vm185_vm0, %v753_v14 }
 0x1cd   : > { %v658_v21 = vpop.f32.mrb[0].mxu1 }
 0x1ce   : > { %v682_v22 = vtrunc.f32 %v658_v21  ;;  %v321_v23 = vpop.f32.mrb[1].mxu1 }
 0x1cf   : > { %v678_v24 = vtrunc.f32 %v321_v23  ;;  %v659_v25 = vpop.f32.mrb[2].mxu1 }
 0x1d0   : > { %v684_v26 = vtrunc.f32 %v659_v25  ;;  %v324_v27 = vpop.f32.mrb[3].mxu1  ;;  %v683_v29 = vcvt.f32.s32 %v682_v22 }
 0x1d1   : > { %v680_v28 = vtrunc.f32 %v324_v27  ;;  %v679_v31 = vcvt.f32.s32 %v678_v24 }
 0x1d2   : > { %v685_v30 = vcvt.f32.s32 %v684_v26 }
 0x1d3   : > { %v681_v32 = vcvt.f32.s32 %v680_v28 }
 0x1d4   : > { %v341_v33 = vpack.c.b16 %v685_v30, %v683_v29 }
 0x1d5   : > { %v340_v34 = vpack.c.b16 %v681_v32, %v679_v31  ;;  %v664_v35 = vpop.f32.mrb[4].mxu1  ;;  %v670_v36 = vpop.f32.mrb[8].mxu0 }
 0x1d6   : > { %v690_v37 = vtrunc.f32 %v664_v35  ;;  %v379_v38 = vpop.f32.mrb[5].mxu1  ;;  %v698_v39 = vtrunc.f32 %v670_v36  ;;  %v437_v40 = vpop.f32.mrb[9].mxu0 }
 0x1d7   : > { %v342_v41 = vpack.c.b8 %v341_v33, %v340_v34  ;;  %v686_v42 = vtrunc.f32 %v379_v38  ;;  %v665_v43 = vpop.f32.mrb[6].mxu1  ;;  %v694_v44 = vtrunc.f32 %v437_v40  ;;  %v671_v45 = vpop.f32.mrb[10].mxu0 }
 0x1d8   : > { %v692_v46 = vtrunc.f32 %v665_v43  ;;  %v382_v47 = vpop.f32.mrb[7].mxu1  ;;  %v699_v48 = vcvt.f32.s32 %v698_v39  ;;  %v700_v49 = vtrunc.f32 %v671_v45  ;;  %v440_v50 = vpop.f32.mrb[11].mxu0  ;;  %v691_v54 = vcvt.f32.s32 %v690_v37 }
 0x1d9   : > { %344 = vst.msk [vmem:[%s918_s10] sm:$0xff] %vm343_vm1, %v342_v41  ;;  %v688_v51 = vtrunc.f32 %v382_v47  ;;  %v695_v52 = vcvt.f32.s32 %v694_v44  ;;  %v696_v53 = vtrunc.f32 %v440_v50  ;;  %v687_v57 = vcvt.f32.s32 %v686_v42 }
 0x1da   : > { %v693_v55 = vcvt.f32.s32 %v692_v46  ;;  %v701_v56 = vcvt.f32.s32 %v700_v49 }
 0x1db   : > { %v689_v58 = vcvt.f32.s32 %v688_v51  ;;  %v697_v59 = vcvt.f32.s32 %v696_v53 }
 0x1dc   : > { %v399_v60 = vpack.c.b16 %v693_v55, %v691_v54  ;;  %v457_v61 = vpack.c.b16 %v701_v56, %v699_v48 }
 0x1dd   : > { %v398_v62 = vpack.c.b16 %v689_v58, %v687_v57  ;;  %v676_v63 = vpop.f32.mrb[8].mxu1  ;;  %v456_v0 = vpack.c.b16 %v697_v59, %v695_v52 }
 0x1de   : > { %v706_v1 = vtrunc.f32 %v676_v63  ;;  %v495_v2 = vpop.f32.mrb[9].mxu1 }
 0x1df   : > { %v400_v3 = vpack.c.b8 %v399_v60, %v398_v62  ;;  %v702_v4 = vtrunc.f32 %v495_v2  ;;  %v677_v5 = vpop.f32.mrb[10].mxu1  ;;  %v458_v6 = vpack.c.b8 %v457_v61, %v456_v0 }
 0x1e0   : > { %v708_v7 = vtrunc.f32 %v677_v5  ;;  %v498_v8 = vpop.f32.mrb[11].mxu1  ;;  %v707_v10 = vcvt.f32.s32 %v706_v1 }
 0x1e1   : > { %613 = vst.msk [vmem:[%s918_s10 + $0x8] sm:$0xff] %vm343_vm1, %v400_v3  ;;  %616 = vst.msk [vmem:[%s918_s10 + $0x10] sm:$0xff] %vm343_vm1, %v458_v6  ;;  %v704_v9 = vtrunc.f32 %v498_v8  ;;  %v703_v12 = vcvt.f32.s32 %v702_v4 }
 0x1e2   : > { %v709_v11 = vcvt.f32.s32 %v708_v7 }
 0x1e3   : > { %v705_v13 = vcvt.f32.s32 %v704_v9 }
 0x1e4   : > { %v515_v14 = vpack.c.b16 %v709_v11, %v707_v10 }
 0x1e5   : > { %v514_v15 = vpack.c.b16 %v705_v13, %v703_v12 }
 0x1e7   : > { %v516_v16 = vpack.c.b8 %v515_v14, %v514_v15 }
 0x1e9   : > { %619 = vst.msk [vmem:[%s918_s10 + $0x18] sm:$0xff] %vm343_vm1, %v516_v16 }
 0x1ea   : > { %767 = shalt.err (!%p764_p3)
}
 0x1eb   : > { %s768_s29 = scalar_lea.hbm %s931_s24, 512  ;;  %s772_s5 = scalar_lea.hbm %s983_s3, 1024 }
 0x1ec   : > { %p769_p4 = scmp.ne.s32.totalorder %s931_s24, %s768_s29  ;;  %p773_p9 = scmp.lt.u32.totalorder %s931_s24, %s983_s3 }
 0x1ed   : > { %p774_p10 = scmp.lt.u32.totalorder %s772_s5, %s768_s29  ;;  %p776_p12 = scmp.lt.u32.totalorder %s768_s29, %s931_s24 }
 0x1ee   : > { %p770_p7 = pnand %p769_p4, %p879_p5 }
 0x1ef   : > { %p775_p11 = por %p774_p10, %p773_p9 }
 0x1f0   : > { %p771_p8 = pneg %p770_p7 }
 0x1f1   : > { %p777_p13 = por %p776_p12, %p775_p11 }
 0x1f3   : > { %p778_p0 = pnand %p777_p13, %p771_p8 }
 0x1f5   : > { %781 = shalt.err (!%p778_p0)
}
 0x1f6   : > { %s819_s8 = smov 128   ;;  %s820_s9 = smov 8  }
 0x1f7   : > { %710 = dma.vmem_to_hbm [thread:$0]  (%p879_p5), %s933_s17, 512, %s931_s24, %s939_s25, %s819_s8, %s819_s8, %s820_s9  }
 0x1f8 PF: > { %p716_p1 = scmp.ge.s32.totalorder %s816_s15, 2  ;;  %s548_s10 = sand.u32 1, %s804_s12  }
 0x1f9   : > { %s549_s11 = scalar_lea.sflag [#allocation3], %s548_s10 }
 0x1fa   : > { %p713_p2 = pnand %p716_p1, %p883_p6 }
 0x1fc   : > { %799 = dma.done.wait (!%p713_p2), %s549_s11, 512  }
 0x1fd   : > { %801 = vsyncadd (!%p713_p2), %s549_s11, 4294966784  ;;  %p13_p3 = scmp.ge.s32.totalorder %s866_s18, 4   ;;  %s986_s12 = smov %s808_s13 }
 0x1fe   : > { %s987_s13 = smov %s812_s14  ;;  %s988_s14 = smov %s877_s21 }
 0x1ff   : > { %s989_s15 = smov %s866_s18  ;;  %15 = sbr.rel (!%p13_p3) target bundleno = 3 (0x3), region = 70 }
 0x206   :  { %554 = vsyncpa [#allocation3], 1 }
 0x207   :  { %556 = vsyncpa [#allocation3 + $0x1], 1 }

</bundles_post_ra>
